<compile_context>
chip_gen: v7x
topology: tpu7x:2x2x1
jax: 0.10.0
libtpu: 0.0.40
codegen_flags: <defaults>
</compile_context>

<pallas_src>
import jax
import jax.numpy as jnp
from jax.experimental import pallas as pl
from jax.experimental.pallas import tpu as pltpu


# ----------------------------------------------------------------------------
# Parameter packing (hoist once; weights don't change across the ACR loop).
# ----------------------------------------------------------------------------
def pack_combiner_params(weight, bias):
    """Pack nn.Linear(3,1) params as f32[4] = [w0, w1, w2, b] for SMEM."""
    return jnp.concatenate([
        jnp.asarray(weight, jnp.float32).reshape(3),
        jnp.asarray(bias, jnp.float32).reshape(1),
    ])


# ----------------------------------------------------------------------------
# Single-evaluation kernel: everything on the scalar path (SMEM in, SMEM out).
# ----------------------------------------------------------------------------
def _combiner_scalar_kernel(x_ref, wb_ref, o_ref):
    # x_ref:  SMEM f32[3] = [c, i, j]
    # wb_ref: SMEM f32[4] = [w0, w1, w2, b]
    # o_ref:  SMEM f32[1]
    o_ref[0] = (x_ref[0] * wb_ref[0]
                + x_ref[1] * wb_ref[1]
                + x_ref[2] * wb_ref[2]
                + wb_ref[3])


def combiner_forward(c, i, j, wb_packed):
    """Pallas equivalent of Combiner.forward(c, i, j).

    Args:
      c, i, j:   python/JAX scalars.
      wb_packed: f32[4] from pack_combiner_params(weight, bias) — pack ONCE
                 outside the hot loop.

    Returns:
      (1,) f32 array, matching the PyTorch output shape.
    """
    x = jnp.stack([jnp.asarray(c, jnp.float32),
                   jnp.asarray(i, jnp.float32),
                   jnp.asarray(j, jnp.float32)])      # (3,) -> SMEM
    out = pl.pallas_call(
        _combiner_scalar_kernel,
        out_shape=jax.ShapeDtypeStruct((1,), jnp.float32),
        in_specs=[pl.BlockSpec(memory_space=pltpu.SMEM),
                  pl.BlockSpec(memory_space=pltpu.SMEM)],
        out_specs=pl.BlockSpec(memory_space=pltpu.SMEM),
    )(x, wb_packed)
    return out


# ----------------------------------------------------------------------------
# Batched kernel: N triples, dense (rows, 128) tiles, three separate streams.
# ----------------------------------------------------------------------------
_LANES = 128
_MAX_TILE_ROWS = 2048   # 2048*128*4B = 1 MiB/buffer; ~8 MiB double-buffered
                        # total -> well under default scoped VMEM on v5e/v6e/v7x.


def _combiner_batched_kernel(wb_ref, c_ref, i_ref, j_ref, o_ref):
    # wb_ref: SMEM f32[4] = [w0, w1, w2, b]
    # c/i/j_ref: VMEM [tr, 128] (f32 or bf16) — full-vreg dense tiles
    # o_ref:     VMEM f32[tr, 128] — unmasked dense store
    w0 = wb_ref[0]
    w1 = wb_ref[1]
    w2 = wb_ref[2]
    b = wb_ref[3]
    # f32 SMEM scalars promote bf16 inputs to f32 automatically; accumulate f32.
    o_ref[...] = c_ref[...] * w0 + i_ref[...] * w1 + j_ref[...] * w2 + b


def _pick_row_tile(rows):
    """Largest multiple-of-8 row tile dividing `rows`, capped at _MAX_TILE_ROWS,
    preferring >= 2 grid steps (lets v7x shard the batch over both TCs)."""
    if rows % 8 != 0 or rows <= 8:
        return rows                       # full-extent block (layout rule allows it)
    cap = min(_MAX_TILE_ROWS, rows // 2)  # keep at least 2 grid steps when possible
    cand = max(8, (cap // 8) * 8)
    while cand >= 8:
        if rows % cand == 0:
            return cand
        cand -= 8
    return rows


def combiner_forward_batched(cs, ivs, jvs, weight, bias, *, row_tile=None):
    """Evaluate Combiner on N (c, i, j) triples at once.

    cs/ivs/jvs: (N,) arrays (f32 or bf16). Any N; padded lanes are computed and
    sliced off. Returns (N,) f32.
    """
    cs = jnp.asarray(cs)
    ivs = jnp.asarray(ivs)
    jvs = jnp.asarray(jvs)
    n = cs.shape[0]
    n_pad = ((n + _LANES - 1) // _LANES) * _LANES
    rows = n_pad // _LANES

    def prep(x):
        if x.dtype not in (jnp.float32, jnp.bfloat16):
            x = x.astype(jnp.float32)
        if n_pad != n:
            x = jnp.pad(x, (0, n_pad - n))
        return x.reshape(rows, _LANES)    # free re-layout, no stack/copy of 3N

    c2, i2, j2 = prep(cs), prep(ivs), prep(jvs)

    tr = _pick_row_tile(rows) if row_tile is None else row_tile
    assert rows % tr == 0, "row_tile must divide N/128 (after lane padding)"

    wb = pack_combiner_params(weight, bias)

    tile_spec = pl.BlockSpec((tr, _LANES), lambda k: (k, 0))
    out = pl.pallas_call(
        _combiner_batched_kernel,
        out_shape=jax.ShapeDtypeStruct((rows, _LANES), jnp.float32),
        grid=(rows // tr,),
        in_specs=[
            pl.BlockSpec(memory_space=pltpu.SMEM),   # [w0,w1,w2,b]
            tile_spec,                               # c tile
            tile_spec,                               # i tile
            tile_spec,                               # j tile
        ],
        out_specs=tile_spec,
        compiler_params=pltpu.CompilerParams(
            dimension_semantics=("parallel",)),
    )(wb, c2, i2, j2)
    return out.reshape(n_pad)[:n]


if __name__ == "__main__":
    key = jax.random.PRNGKey(0)
    k_w, k_b, k_in, k_batch = jax.random.split(key, 4)

    # Deterministic parameter init mirroring nn.Linear(3, 1):
    # uniform(-1/sqrt(in_features), 1/sqrt(in_features))
    bound = 1.0 / jnp.sqrt(3.0)
    weight = jax.random.uniform(k_w, (1, 3), jnp.float32, -bound, bound)
    bias = jax.random.uniform(k_b, (1,), jnp.float32, -bound, bound)

    # Hoist the constant packing once (weights don't change across the loop).
    wb = pack_combiner_params(weight, bias)

    # ---- single (c, i, j) triple, matching the PyTorch forward exactly ----
    scalars = jax.random.normal(k_in, (3,), jnp.float32)
    c, i, j = scalars[0], scalars[1], scalars[2]

    out = combiner_forward(c, i, j, wb)
    jax.block_until_ready(out)

    x = jnp.stack([c, i, j]).reshape(1, 3)
    ref = (x @ weight.T + bias).reshape(1)
    assert out.shape == (1,)
    assert jnp.allclose(out, ref, atol=1e-5, rtol=1e-5), (out, ref)

    # ---- batched variant: N triples, dense (rows, 128) tiles, >=2 grid steps ----
    N = 2000   # not a multiple of 128 -> exercises the padding path too
    triples = jax.random.normal(k_batch, (3, N), jnp.float32)
    cs, ivs, jvs = triples[0], triples[1], triples[2]

    out_b = combiner_forward_batched(cs, ivs, jvs, weight, bias)
    jax.block_until_ready(out_b)

    ref_b = (triples.T @ weight.T + bias).reshape(N)
    assert out_b.shape == (N,)
    assert jnp.allclose(out_b, ref_b, atol=1e-5, rtol=1e-5)

    print("KERNEL_OK")
</pallas_src>

<mosaic_0001>
module attributes {stable_mosaic.version = 11 : i64} {
  func.func @_combiner_scalar_kernel(%arg0: memref<3xf32, #tpu.memory_space<smem>>, %arg1: memref<4xf32, #tpu.memory_space<smem>>, %arg2: memref<1xf32, #tpu.memory_space<smem>>) attributes {dimension_semantics = [], scalar_prefetch = 0 : i64, scratch_operands = 0 : i64, tpu.core_type = #tpu.core_type<tc>} {
    %c0 = arith.constant 0 : index
    %0 = memref.load %arg0[%c0] : memref<3xf32, #tpu.memory_space<smem>>
    %c0_0 = arith.constant 0 : index
    %1 = memref.load %arg1[%c0_0] : memref<4xf32, #tpu.memory_space<smem>>
    %2 = arith.mulf %0, %1 : f32
    %c1 = arith.constant 1 : index
    %3 = memref.load %arg0[%c1] : memref<3xf32, #tpu.memory_space<smem>>
    %c1_1 = arith.constant 1 : index
    %4 = memref.load %arg1[%c1_1] : memref<4xf32, #tpu.memory_space<smem>>
    %5 = arith.mulf %3, %4 : f32
    %6 = arith.addf %2, %5 : f32
    %c2 = arith.constant 2 : index
    %7 = memref.load %arg0[%c2] : memref<3xf32, #tpu.memory_space<smem>>
    %c2_2 = arith.constant 2 : index
    %8 = memref.load %arg1[%c2_2] : memref<4xf32, #tpu.memory_space<smem>>
    %9 = arith.mulf %7, %8 : f32
    %10 = arith.addf %6, %9 : f32
    %c3 = arith.constant 3 : index
    %11 = memref.load %arg1[%c3] : memref<4xf32, #tpu.memory_space<smem>>
    %12 = arith.addf %10, %11 : f32
    %c0_3 = arith.constant 0 : index
    %13 = memref.load %arg2[%c0_3] : memref<1xf32, #tpu.memory_space<smem>>
    memref.store %12, %arg2[%c0_3] : memref<1xf32, #tpu.memory_space<smem>>
    return
  }
}

</mosaic_0001>

<bundles_post_ra>
// kernel: tpu_custom_call.1
= control target key start
LH: loop header
LB: loop body
LE: loop exit
PB: predicated region body
PF: predicated region fallthrough
CT: control target
= control target key end

     0   :  { %7 = vsyncpa [#allocation3], 0  ;;  %s156_s0 = inlined_call_operand.hbm [shape: f32[3], index: 0, kind: input, shape index: {}]   ;;  %s157_s1 = inlined_call_operand.vmem [shape: f32[4], index: 1, kind: input, shape index: {}]   ;;  %s158_s2 = inlined_call_operand.hbm [shape: f32[1], index: 2, kind: output, shape index: {}]  }
   0x1   :  { %8 = vsyncpa [#allocation5], 0 }
   0x2   :  { %9 = vsyncpa [#allocation4], 0  ;;  %s24_s11 = sshll.u32 %s157_s1, 4  ;;  %s73_s14 = scalar_lea.hbm %s156_s0, 16  ;;  %s25_s11 = int_to_ptr.vmem [resolvable:$true] %s24_s11 }
   0x3   :  { %p74_p0 = scmp.ne.s32.totalorder %s156_s0, %s73_s14  ;;  %p77_p1 = scmp.lt.u32.totalorder %s73_s14, %s156_s0 }
   0x5   :  { %p79_p2 = pnand %p77_p1, %p74_p0 }
   0x7   :  { %82 = shalt.err (!%p79_p2)
}
   0x8   :  { %s111_s19 = smov [#allocation2]   ;;  %s83_s1 = scalar_lea.vmem %s25_s11, 16 }
   0x9   :  { %17 = dma.hbm_to_smem %s156_s0, 16, %s111_s19, [#allocation3]  }
   0xa   :  { %p84_p3 = scmp.ne.s32.totalorder %s25_s11, %s83_s1  ;;  %p88_p4 = scmp.lt.s32.totalorder %s25_s11, %s25_s11 }
   0xb   :  { %p89_p5 = scmp.lt.s32.totalorder %s83_s1, %s83_s1 }
   0xd   :  { %p90_p6 = por %p89_p5, %p88_p4 }
   0xf   :  { %p91_p7 = pnand %p90_p6, %p84_p3 }
  0x11   :  { %94 = shalt.err (!%p91_p7)
}
  0x12   :  { %s112_s22 = smov [#allocation6]  }
  0x13   :  { %27 = dma.vmem_to_smem %s25_s11, 16, %s112_s22, [#allocation5]  }
  0x14   :  { %105 = dma.done.wait [#allocation3], 16  }
  0x15   :  { %106 = vsyncadd [#allocation3], 4294967280 }
  0x16   :  { %107 = dma.done.wait [#allocation5], 16  }
  0x17   :  { %108 = vsyncadd [#allocation5], 4294967280 }
  0x18   :  { %34 = sfence }
  0x19   :  { %s35_s23 = sld [smem:[#allocation2]]  ;;  %s65_s25 = sld [smem:[#allocation2 + $0x1]] }
  0x1a   :  { %s36_s24 = sld [smem:[#allocation6]]  ;;  %s66_s26 = sld [smem:[#allocation6 + $0x1]] }
  0x1b   :  { %s67_s0 = sld [smem:[#allocation2 + $0x2]]  ;;  %s69_s28 = sld [smem:[#allocation6 + $0x3]] }
  0x1c   :  { %s68_s27 = sld [smem:[#allocation6 + $0x2]]  ;;  %s95_s9 = scalar_lea.hbm %s158_s2, 16 }
  0x1d   :  { %p96_p8 = scmp.ne.s32.totalorder %s158_s2, %s95_s9  ;;  %p99_p9 = scmp.lt.u32.totalorder %s95_s9, %s158_s2 }
  0x1f   :  { %p101_p10 = pnand %p99_p9, %p96_p8 }
  0x20   :  { %s37_s29 = smul.f32 %s36_s24, %s35_s23 }
  0x21   :  { %s40_s30 = smul.f32 %s66_s26, %s65_s25 }
  0x22   :  { %s44_s3 = smul.f32 %s68_s27, %s67_s0 }
  0x23   :  { %s41_s4 = sadd.f32 %s40_s30, %s37_s29 }
  0x25   :  { %s45_s5 = sadd.f32 %s44_s3, %s41_s4 }
  0x27   :  { %s47_s6 = sadd.f32 %s69_s28, %s45_s5 }
  0x29   :  { %49 = sst [smem:[#allocation7]] %s47_s6 }
  0x2a   :  { %104 = shalt.err (!%p101_p10)
}
  0x2b   :  { %s113_s14 = smov [#allocation7]  }
  0x2c   :  { %57 = dma.smem_to_hbm %s113_s14, 16, %s158_s2, [#allocation4]  }
  0x2d   :  { %109 = dma.done.wait [#allocation4], 16  }
  0x2e   :  { %110 = vsyncadd [#allocation4], 4294967280 }
  0x2f   :  { %61 = sfence }
  0x30   :  { %62 = vsyncpa [#allocation3], 1 }
  0x31   :  { %63 = vsyncpa [#allocation4], 1 }
  0x32   :  { %64 = vsyncpa [#allocation5], 1 }

</bundles_post_ra>
